<compile_context>
chip_gen: v7x
topology: tpu7x:2x2x1
jax: 0.10.0
libtpu: 0.0.40
codegen_flags: <defaults>
</compile_context>

<pallas_src>
import jax
import jax.numpy as jnp
from jax.experimental import pallas as pl
from jax.experimental.pallas import tpu as pltpu


def _round_up(a, b):
    return (a + b - 1) // b * b


def _ffn_kernel(x_ref, w13_ref, w2_ref, o_ref, acc_ref):
    """Grid: (i over M tiles, k over hidden tiles). acc_ref is f32 (tm, dim)."""
    k = pl.program_id(1)

    @pl.when(k == 0)
    def _():
        acc_ref[...] = jnp.zeros_like(acc_ref)

    th = w2_ref.shape[0]

    # Fused w1|w3 matmul: native-dtype operands on the MXU, f32 accumulation.
    h = jnp.dot(x_ref[...], w13_ref[...], preferred_element_type=jnp.float32)
    h1 = h[:, :th]          # x @ w1 tile   (f32)
    h3 = h[:, th:]          # x @ w3 tile   (f32)

    # silu(h1) * h3 in f32 (sigmoid goes to the EUP, mul/gating to the VPU).
    gated = (h1 * jax.nn.sigmoid(h1)) * h3

    # Second MXU matmul: cast gated back to the weight dtype (bf16 path).
    acc_ref[...] += jnp.dot(
        gated.astype(w2_ref.dtype), w2_ref[...],
        preferred_element_type=jnp.float32,
    )

    @pl.when(k == pl.num_programs(1) - 1)
    def _():
        o_ref[...] = acc_ref[...].astype(o_ref.dtype)


def feed_forward(x, w1t, w3t, w2t, *, tile_m=None, tile_h=None):
    """x: (B, T, dim); w1t/w3t: (dim, hidden); w2t: (hidden, dim)."""
    B, T, dim = x.shape
    dim_w, hidden = w1t.shape
    assert dim_w == dim and w3t.shape == (dim, hidden) and w2t.shape == (hidden, dim)
    out_dtype = x.dtype

    # --- pad hidden to a multiple of 128 (lane-aligned split of the fused
    # w1|w3 result; exact for SwiGLU since padded columns/rows are zero) ---
    hidden_pad = _round_up(hidden, 128)
    if hidden_pad != hidden:
        hp = hidden_pad - hidden
        w1t = jnp.pad(w1t, ((0, 0), (0, hp)))
        w3t = jnp.pad(w3t, ((0, 0), (0, hp)))
        w2t = jnp.pad(w2t, ((0, hp), (0, 0)))

    # --- hidden tile: largest 128-multiple divisor (<=512 keeps the default
    # config inside v7x's 64 MiB VMEM; pass tile_h=1024+ on v5e/v6e). Prefer
    # 256-multiples on v6e/v7x (256-wide MXU) when the shape allows. ---
    if tile_h is None:
        for cand in (512, 256, 128):
            if hidden_pad % cand == 0:
                tile_h = cand
                break
    assert hidden_pad % tile_h == 0
    K = hidden_pad // tile_h

    # --- fuse w1|w3 per hidden tile: last-axis block k = [w1_k | w3_k] ---
    w13 = jnp.concatenate(
        [w1t.reshape(dim, K, tile_h), w3t.reshape(dim, K, tile_h)], axis=2
    ).reshape(dim, K * 2 * tile_h)

    # --- M tiling (pad ragged M with zero rows; sliced off afterwards) ---
    M = B * T
    itemsize = jnp.dtype(out_dtype).itemsize
    min_sublane = max(8, 32 // itemsize)          # 8 for f32, 16 for bf16
    if tile_m is None:
        tile_m = 256 if M >= 256 else _round_up(M, min_sublane)
    M_pad = _round_up(M, tile_m)
    x2d = x.reshape(M, dim)
    if M_pad != M:
        x2d = jnp.pad(x2d, ((0, M_pad - M), (0, 0)))

    grid = (M_pad // tile_m, K)  # reduction (hidden) axis last

    out2d = pl.pallas_call(
        _ffn_kernel,
        out_shape=jax.ShapeDtypeStruct((M_pad, dim), out_dtype),
        grid_spec=pltpu.PrefetchScalarGridSpec(
            num_scalar_prefetch=0,
            grid=grid,
            in_specs=[
                pl.BlockSpec((tile_m, dim), lambda i, k: (i, 0)),       # x
                pl.BlockSpec((dim, 2 * tile_h), lambda i, k: (0, k)),   # w1|w3
                pl.BlockSpec((tile_h, dim), lambda i, k: (k, 0)),       # w2
            ],
            out_specs=pl.BlockSpec((tile_m, dim), lambda i, k: (i, 0)),
            scratch_shapes=[pltpu.VMEM((tile_m, dim), jnp.float32)],    # acc
        ),
        compiler_params=pltpu.CompilerParams(
            # M axis parallel (megacore split on v7x), hidden axis is the
            # carried reduction.
            dimension_semantics=("parallel", "arbitrary"),
            # <= physical VMEM on every generation (v7x has 64 MiB/TC);
            # default tiles keep residency well below this.
            vmem_limit_bytes=64 << 20,
        ),
    )(x2d, w13, w2t)

    if M_pad != M:
        out2d = out2d[:M]
    return out2d.reshape(B, T, dim)
    # TODO(synk): nn.Dropout with p>0 in training mode is not implemented; it
    # acts as identity here, matching PyTorch inference semantics.


def _swiglu_hidden(dim, hidden_dim, multiple_of):
    hidden_dim = int(2 * hidden_dim / 3)
    hidden_dim = multiple_of * ((hidden_dim + multiple_of - 1) // multiple_of)
    return hidden_dim


def init_params(key, dim, hidden_dim, multiple_of, dtype=jnp.float32):
    hidden = _swiglu_hidden(dim, hidden_dim, multiple_of)
    k1, k2, k3 = jax.random.split(key, 3)
    # nn.Linear default init: U(-1/sqrt(fan_in), 1/sqrt(fan_in))
    b1 = 1.0 / (dim ** 0.5)
    b2 = 1.0 / (hidden ** 0.5)
    w1 = jax.random.uniform(k1, (hidden, dim), jnp.float32, -b1, b1)  # (out, in)
    w3 = jax.random.uniform(k3, (hidden, dim), jnp.float32, -b1, b1)
    w2 = jax.random.uniform(k2, (dim, hidden), jnp.float32, -b2, b2)
    # pre-transpose for the kernel, cast to target dtype
    return w1.T.astype(dtype), w3.T.astype(dtype), w2.T.astype(dtype), hidden


def reference(x, w1t, w3t, w2t):
    hi = jnp.einsum("btd,dh->bth", x, w1t, precision=jax.lax.Precision.HIGHEST)
    h3 = jnp.einsum("btd,dh->bth", x, w3t, precision=jax.lax.Precision.HIGHEST)
    g = (hi * jax.nn.sigmoid(hi)) * h3
    return jnp.einsum("bth,hd->btd", g, w2t, precision=jax.lax.Precision.HIGHEST)


if __name__ == "__main__":
    key = jax.random.PRNGKey(0)

    # ---- Test 1: toy module config in f32 (dim < 128 -> demo config) ----
    batch, seq = 2, 8
    dim, hidden_dim_arg, multiple_of = 32, 128, 32
    kx, kp, key = jax.random.split(key, 3)
    w1t, w3t, w2t, hidden = init_params(kp, dim, hidden_dim_arg, multiple_of,
                                        dtype=jnp.float32)
    x = jax.random.normal(kx, (batch, seq, dim), jnp.float32)

    out = feed_forward(x, w1t, w3t, w2t)
    out = jax.block_until_ready(out)
    ref = reference(x, w1t, w3t, w2t)
    assert out.shape == (batch, seq, dim)
    assert jnp.allclose(out, ref, atol=5e-4, rtol=5e-4), "f32 mismatch vs reference"

    # ---- Test 2: bf16, exercises hidden-dim tiling (K > 1) + fused w1|w3 ----
    batch2, seq2 = 2, 64
    dim2, hidden_dim_arg2, multiple_of2 = 256, 1024, 256   # -> hidden = 768
    kx2, kp2 = jax.random.split(key)
    w1t2, w3t2, w2t2, hidden2 = init_params(kp2, dim2, hidden_dim_arg2,
                                            multiple_of2, dtype=jnp.bfloat16)
    x2 = jax.random.normal(kx2, (batch2, seq2, dim2), jnp.float32).astype(jnp.bfloat16)

    out2 = feed_forward(x2, w1t2, w3t2, w2t2)
    out2 = jax.block_until_ready(out2)
    ref2 = reference(x2.astype(jnp.float32), w1t2.astype(jnp.float32),
                     w3t2.astype(jnp.float32), w2t2.astype(jnp.float32))
    assert out2.shape == (batch2, seq2, dim2)
    assert jnp.allclose(out2.astype(jnp.float32), ref2, atol=2e-2, rtol=2e-2), \
        "bf16 mismatch vs reference"

    print("KERNEL_OK")
</pallas_src>

<mosaic_0001>
module attributes {stable_mosaic.version = 11 : i64} {
  func.func @_ffn_kernel(%arg0: i32, %arg1: i32, %arg2: memref<16x32xf32, #tpu.memory_space<vmem>>, %arg3: memref<32x256xf32, #tpu.memory_space<vmem>>, %arg4: memref<128x32xf32, #tpu.memory_space<vmem>>, %arg5: memref<16x32xf32, #tpu.memory_space<vmem>>, %arg6: memref<16x32xf32, #tpu.memory_space<vmem>>) attributes {dimension_semantics = [#tpu.dimension_semantics<parallel>, #tpu.dimension_semantics<arbitrary>], iteration_bounds = array<i64: 1, 1>, scalar_prefetch = 0 : i64, scratch_operands = 1 : i64, tpu.core_type = #tpu.core_type<tc>, window_params = [{transform_indices = @transform_0, window_bounds = array<i64: 16, 32>}, {transform_indices = @transform_1, window_bounds = array<i64: 32, 256>}, {transform_indices = @transform_2, window_bounds = array<i64: 128, 32>}, {transform_indices = @transform_3, window_bounds = array<i64: 16, 32>}]} {
    %c0_i32 = arith.constant 0 : i32
    %0 = arith.cmpi eq, %arg1, %c0_i32 : i32
    %1 = arith.extui %0 : i1 to i32
    %c0_i32_0 = arith.constant 0 : i32
    %2 = arith.cmpi ne, %1, %c0_i32_0 : i32
    scf.if %2 {
      %cst_14 = arith.constant 0.000000e+00 : f32
      %23 = vector.broadcast %cst_14 : f32 to vector<16x32xf32>
      %c0_15 = arith.constant 0 : index
      %c0_16 = arith.constant 0 : index
      %24 = vector.load %arg6[%c0_15, %c0_16] : memref<16x32xf32, #tpu.memory_space<vmem>>, vector<16x32xf32>
      tpu.vector_store %arg6[%c0_15, %c0_16], %23 {strides = array<i32>} : memref<16x32xf32, #tpu.memory_space<vmem>>, vector<16x32xf32>,
    } else {
    }
    %c0 = arith.constant 0 : index
    %c0_1 = arith.constant 0 : index
    %3 = vector.load %arg2[%c0, %c0_1] : memref<16x32xf32, #tpu.memory_space<vmem>>, vector<16x32xf32>
    %c0_2 = arith.constant 0 : index
    %c0_3 = arith.constant 0 : index
    %4 = vector.load %arg3[%c0_2, %c0_3] : memref<32x256xf32, #tpu.memory_space<vmem>>, vector<32x256xf32>
    %cst = arith.constant dense<0.000000e+00> : vector<16x256xf32>
    %5 = tpu.matmul %3, %4, %cst {dimension_numbers = #tpu.dot_dimension_numbers<[1], [0], [0], [1], [0, 0, 1, 1], [], []>} : vector<16x32xf32>, vector<32x256xf32>, vector<16x256xf32> -> vector<16x256xf32>
    %6 = vector.extract_strided_slice %5 {offsets = [0, 0], sizes = [16, 128], strides = [1, 1]} : vector<16x256xf32> to vector<16x128xf32>
    %7 = vector.extract_strided_slice %5 {offsets = [0, 128], sizes = [16, 128], strides = [1, 1]} : vector<16x256xf32> to vector<16x128xf32>
    %8 = arith.negf %6 : vector<16x128xf32>
    %9 = math.exp %8 : vector<16x128xf32>
    %cst_4 = arith.constant 1.000000e+00 : f32
    %10 = vector.broadcast %cst_4 : f32 to vector<16x128xf32>
    %11 = arith.addf %10, %9 : vector<16x128xf32>
    %12 = arith.divf %10, %11 : vector<16x128xf32>
    %13 = arith.mulf %6, %12 : vector<16x128xf32>
    %14 = arith.mulf %13, %7 : vector<16x128xf32>
    %c0_5 = arith.constant 0 : index
    %c0_6 = arith.constant 0 : index
    %15 = vector.load %arg6[%c0_5, %c0_6] : memref<16x32xf32, #tpu.memory_space<vmem>>, vector<16x32xf32>
    %c0_7 = arith.constant 0 : index
    %c0_8 = arith.constant 0 : index
    %16 = vector.load %arg4[%c0_7, %c0_8] : memref<128x32xf32, #tpu.memory_space<vmem>>, vector<128x32xf32>
    %cst_9 = arith.constant dense<0.000000e+00> : vector<16x32xf32>
    %17 = tpu.matmul %14, %16, %cst_9 {dimension_numbers = #tpu.dot_dimension_numbers<[1], [0], [0], [1], [0, 0, 1, 1], [], []>} : vector<16x128xf32>, vector<128x32xf32>, vector<16x32xf32> -> vector<16x32xf32>
    %18 = arith.addf %15, %17 : vector<16x32xf32>
    %c0_10 = arith.constant 0 : index
    %c0_11 = arith.constant 0 : index
    %19 = vector.load %arg6[%c0_10, %c0_11] : memref<16x32xf32, #tpu.memory_space<vmem>>, vector<16x32xf32>
    tpu.vector_store %arg6[%c0_10, %c0_11], %18 {strides = array<i32>} : memref<16x32xf32, #tpu.memory_space<vmem>>, vector<16x32xf32>,
    %c0_i32_12 = arith.constant 0 : i32
    %20 = arith.cmpi eq, %arg1, %c0_i32_12 : i32
    %21 = arith.extui %20 : i1 to i32
    %c0_i32_13 = arith.constant 0 : i32
    %22 = arith.cmpi ne, %21, %c0_i32_13 : i32
    scf.if %22 {
      %c0_14 = arith.constant 0 : index
      %c0_15 = arith.constant 0 : index
      %23 = vector.load %arg6[%c0_14, %c0_15] : memref<16x32xf32, #tpu.memory_space<vmem>>, vector<16x32xf32>
      %c0_16 = arith.constant 0 : index
      %c0_17 = arith.constant 0 : index
      %24 = vector.load %arg5[%c0_16, %c0_17] : memref<16x32xf32, #tpu.memory_space<vmem>>, vector<16x32xf32>
      tpu.vector_store %arg5[%c0_16, %c0_17], %23 {strides = array<i32>} : memref<16x32xf32, #tpu.memory_space<vmem>>, vector<16x32xf32>,
    } else {
    }
    return
  }
  func.func @transform_0(%arg0: i32, %arg1: i32) -> (i32, i32) {
    %c0_i32 = arith.constant 0 : i32
    %c0_i32_0 = arith.constant 0 : i32
    return %arg0, %c0_i32 : i32, i32
  }
  func.func @transform_1(%arg0: i32, %arg1: i32) -> (i32, i32) {
    %c0_i32 = arith.constant 0 : i32
    %c0_i32_0 = arith.constant 0 : i32
    return %c0_i32, %arg1 : i32, i32
  }
  func.func @transform_2(%arg0: i32, %arg1: i32) -> (i32, i32) {
    %c0_i32 = arith.constant 0 : i32
    %c0_i32_0 = arith.constant 0 : i32
    return %arg1, %c0_i32 : i32, i32
  }
  func.func @transform_3(%arg0: i32, %arg1: i32) -> (i32, i32) {
    %c0_i32 = arith.constant 0 : i32
    %c0_i32_0 = arith.constant 0 : i32
    return %arg0, %c0_i32 : i32, i32
  }
}

</mosaic_0001>

<bundles_post_ra>
// kernel: tpu_custom_call.1
= control target key start
LH: loop header
LB: loop body
LE: loop exit
PB: predicated region body
PF: predicated region fallthrough
CT: control target
= control target key end

     0   :  { %8 = vsyncpa [#allocation4], 0  ;;  %s597_s0 = inlined_call_operand.hbm [shape: f32[16,32], index: 0, kind: input, shape index: {}]   ;;  %s598_s1 = inlined_call_operand.hbm [shape: f32[32,256], index: 1, kind: input, shape index: {}]   ;;  %s599_s2 = inlined_call_operand.hbm [shape: f32[128,32], index: 2, kind: input, shape index: {}]   ;;  %s600_s3 = inlined_call_operand.hbm [shape: f32[16,32], index: 3, kind: output, shape index: {}]  }
   0x1   :  { %9 = vsyncpa [#allocation7], 0 }
   0x2   :  { %10 = vsyncpa [#allocation5], 0  ;;  %s503_s12 = smov [#allocation6]   ;;  %s409_s16 = scalar_lea.hbm %s598_s1, 1024 }
   0x3   :  { %s28_s13 = sshll.u32 %s503_s12, 4  ;;  %p410_p0 = scmp.ne.s32.totalorder %s598_s1, %s409_s16  ;;  %s29_s13 = int_to_ptr.vmem [resolvable:$true] %s28_s13 }
   0x4   :  { %p413_p1 = scmp.lt.u32.totalorder %s409_s16, %s598_s1 }
   0x6   :  { %p415_p2 = pnand %p413_p1, %p410_p0 }
   0x8   :  { %418 = shalt.err (!%p415_p2)
}
   0x9   :  { %s419_s21 = scalar_lea.vmem %s29_s13, 1024  ;;  %p424_p4 = scmp.lt.s32.totalorder %s29_s13, %s29_s13 }
   0xa   :  { %p420_p3 = scmp.ne.s32.totalorder %s29_s13, %s419_s21  ;;  %p425_p5 = scmp.lt.s32.totalorder %s419_s21, %s419_s21 }
   0xc   :  { %p426_p6 = por %p425_p5, %p424_p4 }
   0xe   :  { %p427_p7 = pnand %p426_p6, %p420_p3 }
  0x10   :  { %430 = shalt.err (!%p427_p7)
}
  0x11   :  { %s504_s22 = smov 256   ;;  %s505_s23 = smov 16  }
  0x12   :  { %34 = dma.hbm_to_vmem [thread:$0]  %s598_s1, 1024, %s29_s13, [#allocation7], %s504_s22, %s504_s22, %s505_s23  }
  0x13   :  { %s506_s26 = smov [#allocation3]   ;;  %s431_s30 = scalar_lea.hbm %s597_s0, 256 }
  0x14   :  { %s16_s27 = sshll.u32 %s506_s26, 4  ;;  %p432_p8 = scmp.ne.s32.totalorder %s597_s0, %s431_s30  ;;  %s17_s27 = int_to_ptr.vmem [resolvable:$true] %s16_s27 }
  0x15   :  { %p435_p9 = scmp.lt.u32.totalorder %s431_s30, %s597_s0 }
  0x17   :  { %p437_p10 = pnand %p435_p9, %p432_p8 }
  0x19   :  { %440 = shalt.err (!%p437_p10)
}
  0x1a   :  { %s441_s8 = scalar_lea.vmem %s17_s27, 256  ;;  %p446_p12 = scmp.lt.s32.totalorder %s17_s27, %s17_s27 }
  0x1b   :  { %p442_p11 = scmp.ne.s32.totalorder %s17_s27, %s441_s8  ;;  %p447_p13 = scmp.lt.s32.totalorder %s441_s8, %s441_s8 }
  0x1d   :  { %p448_p0 = por %p447_p13, %p446_p12 }
  0x1f   :  { %p449_p1 = pnand %p448_p0, %p442_p11 }
  0x21   :  { %452 = shalt.err (!%p449_p1)
}
  0x22   :  { %s507_s1 = smov 128   ;;  %s508_s9 = smov 8  }
  0x23   :  { %22 = dma.hbm_to_vmem [thread:$0]  %s597_s0, 256, %s17_s27, [#allocation4], %s507_s1, %s507_s1, %s508_s9  }
  0x24   :  { %s509_s12 = smov [#allocation8]   ;;  %s453_s16 = scalar_lea.hbm %s599_s2, 2048 }
  0x25   :  { %s40_s13 = sshll.u32 %s509_s12, 4  ;;  %p454_p2 = scmp.ne.s32.totalorder %s599_s2, %s453_s16  ;;  %s41_s13 = int_to_ptr.vmem [resolvable:$true] %s40_s13 }
  0x26   :  { %p457_p3 = scmp.lt.u32.totalorder %s453_s16, %s599_s2 }
  0x28   :  { %p459_p4 = pnand %p457_p3, %p454_p2 }
  0x2a   :  { %462 = shalt.err (!%p459_p4)
}
  0x2b   :  { %s463_s21 = scalar_lea.vmem %s41_s13, 2048  ;;  %p468_p6 = scmp.lt.s32.totalorder %s41_s13, %s41_s13 }
  0x2c   :  { %p464_p5 = scmp.ne.s32.totalorder %s41_s13, %s463_s21  ;;  %p469_p7 = scmp.lt.s32.totalorder %s463_s21, %s463_s21 }
  0x2e   :  { %p470_p8 = por %p469_p7, %p468_p6 }
  0x30   :  { %p471_p9 = pnand %p470_p8, %p464_p5 }
  0x32   :  { %474 = shalt.err (!%p471_p9)
}
  0x33   :  { %46 = dma.hbm_to_vmem [thread:$0]  %s599_s2, 2048, %s41_s13, [#allocation7], %s507_s1, %s507_s1, %s508_s9  }
  0x34   :  { %497 = dma.done.wait [#allocation4], 256  }
  0x35   :  { %498 = vsyncadd [#allocation4], 4294967040 }
  0x36   :  { %499 = dma.done.wait [#allocation7], 3072  }
  0x37   :  { %500 = vsyncadd [#allocation7], 4294964224  ;;  %vm60_vm0 = vcmask 261120   ;;  %v510_v0 = vmov 0.0   ;;  %v66_v1 = vld [vmem:[#allocation6 + $0x8] sm:$0xff]  ;;  %v68_v2 = vld [vmem:[#allocation6 + $0x18] sm:$0xff] }
  0x38   :  { %61 = vst.msk [vmem:[#allocation2] sm:$0xff] %vm60_vm0, %v510_v0  ;;  %62 = vst.msk [vmem:[#allocation2 + $0x8] sm:$0xff] %vm60_vm0, %v510_v0  ;;  %144 = vmatprep.mubr.f32.mxu0 %v510_v0  ;;  %v65_v3 = vld [vmem:[#allocation6] sm:$0xff]  ;;  %v352_v4 = vpack.c.bf16 %v68_v2, %v66_v1  ;;  %v67_v5 = vld [vmem:[#allocation6 + $0x10] sm:$0xff]  ;;  %s511_s2 = smov [#allocation9]  }
  0x39   :  { %v70_v6 = vld [vmem:[#allocation6 + $0x28] sm:$0xff]  ;;  %v72_v7 = vld [vmem:[#allocation6 + $0x38] sm:$0xff]  ;;  %v354_v8 = vpack.c.bf16 %v67_v5, %v65_v3  ;;  %v69_v10 = vld [vmem:[#allocation6 + $0x20] sm:$0xff]  ;;  %s282_s23 = sshll.u32 %s511_s2, 4  ;;  %s283_s23 = int_to_ptr.vmem [resolvable:$true] %s282_s23 }
  0x3a   :  { %v356_v9 = vpack.c.bf16 %v72_v7, %v70_v6  ;;  %v71_v11 = vld [vmem:[#allocation6 + $0x30] sm:$0xff]  ;;  %353 = vmatprep.subr.bf16.mxu0 %v352_v4  ;;  %v64_v14 = vld [vmem:[#allocation3 + $0x8] sm:$0xff]  ;;  %v175_v15 = vld [vmem:[#allocation8] sm:$0xff]  ;;  %s475_s24 = scalar_lea.vmem %s283_s23, 256  ;;  %p480_p11 = scmp.lt.s32.totalorder %s283_s23, %s283_s23 }
  0x3b   :  { %355 = vmatpush1.bf16.msra.mxu0 %v354_v8  ;;  %v358_v12 = vpack.c.bf16 %v71_v11, %v69_v10  ;;  %v63_v13 = vld [vmem:[#allocation3] sm:$0xff]  ;;  %v176_v16 = vld [vmem:[#allocation8 + $0x8] sm:$0xff]  ;;  %v178_v19 = vld [vmem:[#allocation8 + $0x18] sm:$0xff]  ;;  %p476_p10 = scmp.ne.s32.totalorder %s283_s23, %s475_s24  ;;  %p481_p12 = scmp.lt.s32.totalorder %s475_s24, %s475_s24 }
  0x3c   :  { %357 = vmatprep.subr.bf16.mxu0 %v356_v9  ;;  %v360_v17 = vpack.c.bf16 %v176_v16, %v175_v15  ;;  %v177_v18 = vld [vmem:[#allocation8 + $0x10] sm:$0xff]  ;;  %v179_v21 = vld [vmem:[#allocation8 + $0x20] sm:$0xff]  ;;  %v180_v22 = vld [vmem:[#allocation8 + $0x28] sm:$0xff] }
  0x3d   :  { %v364_v20 = vpack.c.bf16 %v178_v19, %v177_v18  ;;  %v368_v23 = vpack.c.bf16 %v180_v22, %v179_v21  ;;  %v181_v24 = vld [vmem:[#allocation8 + $0x30] sm:$0xff]  ;;  %v182_v25 = vld [vmem:[#allocation8 + $0x38] sm:$0xff]  ;;  %v183_v27 = vld [vmem:[#allocation8 + $0x40] sm:$0xff]  ;;  %p482_p13 = por %p481_p12, %p480_p11 }
  0x3e   :  { %361 = vmatprep.subr.bf16.mxu1 %v360_v17  ;;  %v372_v26 = vpack.c.bf16 %v182_v25, %v181_v24  ;;  %v184_v28 = vld [vmem:[#allocation8 + $0x48] sm:$0xff]  ;;  %v185_v30 = vld [vmem:[#allocation8 + $0x50] sm:$0xff]  ;;  %v186_v31 = vld [vmem:[#allocation8 + $0x58] sm:$0xff] }
  0x3f   :  { %359 = vmatpush1.bf16.msra.mxu0 %v358_v12  ;;  %363 = vmatpush3.bf16.msra.mxu1 %v360_v17  ;;  %v376_v29 = vpack.c.bf16 %v184_v28, %v183_v27  ;;  %v380_v32 = vpack.c.bf16 %v186_v31, %v185_v30  ;;  %v187_v33 = vld [vmem:[#allocation8 + $0x60] sm:$0xff]  ;;  %v188_v34 = vld [vmem:[#allocation8 + $0x68] sm:$0xff]  ;;  %v189_v36 = vld [vmem:[#allocation8 + $0x70] sm:$0xff]  ;;  %p483_p0 = pnand %p482_p13, %p476_p10 }
  0x40   :  { %365 = vmatprep.subr.bf16.mxu1 %v364_v20  ;;  %v384_v35 = vpack.c.bf16 %v188_v34, %v187_v33  ;;  %v190_v37 = vld [vmem:[#allocation8 + $0x78] sm:$0xff]  ;;  %v174_v55 = vld [vmem:[#allocation2 + $0x8] sm:$0xff]  ;;  %v173_v56 = vld [vmem:[#allocation2] sm:$0xff] }
  0x41   :  { %v388_v38 = vpack.c.bf16 %v190_v37, %v189_v36 }
  0x42   :  { %295 = vmatmul.mubr.msk.f32.vlgmr.msra.gmra.mrb[0].mxu0 %vm60_vm0, %v63_v13 }
  0x43   :  { %150 = vmatprep.mubr.f32.mxu0 %v510_v0  ;;  %367 = vmatpush3.bf16.msra.mxu1 %v364_v20 }
  0x44   :  { %369 = vmatprep.subr.bf16.mxu1 %v368_v23 }
  0x46   :  { %296 = vmatmul.mubr.msk.f32.gmra.mrb[2].mxu0 %vm60_vm0, %v64_v14 }
  0x47   :  { %371 = vmatpush3.bf16.msra.mxu1 %v368_v23 }
  0x48   :  { %373 = vmatprep.subr.bf16.mxu1 %v372_v26 }
  0x4b   :  { %375 = vmatpush3.bf16.msra.mxu1 %v372_v26 }
  0x4c   :  { %377 = vmatprep.subr.bf16.mxu1 %v376_v29 }
  0x4f   :  { %379 = vmatpush3.bf16.msra.mxu1 %v376_v29 }
  0x50   :  { %381 = vmatprep.subr.bf16.mxu1 %v380_v32 }
  0x53   :  { %383 = vmatpush3.bf16.msra.mxu1 %v380_v32 }
  0x54   :  { %385 = vmatprep.subr.bf16.mxu1 %v384_v35 }
  0x57   :  { %387 = vmatpush3.bf16.msra.mxu1 %v384_v35 }
  0x58   :  { %389 = vmatprep.subr.bf16.mxu1 %v388_v38 }
  0x5b   :  { %391 = vmatpush3.bf16.msra.mxu1 %v388_v38 }
 0x115   :  { %v146_v39 = vpop.f32.mrb[0].mxu0 }
 0x116   :  { %v297_v40 = vmul.f32 -1.442695, %v146_v39  ;;  %v148_v41 = vpop.f32.mrb[1].mxu0 }
 0x118   :  { %401 = vpow2.f32 %v297_v40 }
 0x119   :  { %v152_v42 = vpop.f32.mrb[2].mxu0 }
 0x11a   :  { %v298_v43 = vmul.f32 -1.442695, %v152_v42  ;;  %v154_v44 = vpop.f32.mrb[3].mxu0 }
 0x11c   :  { %403 = vpow2.f32 %v298_v43 }
 0x122   :  { %v402_v45 = vpop.eup %401 }
 0x123   :  { %v163_v46 = vadd.f32 1.0, %v402_v45 }
 0x125   :  { %405 = vrcp.f32 %v163_v46 }
 0x126   :  { %v404_v47 = vpop.eup %403 }
 0x127   :  { %v164_v48 = vadd.f32 1.0, %v404_v47 }
 0x129   :  { %407 = vrcp.f32 %v164_v48 }
 0x12f   :  { %v406_v49 = vpop.eup %405 }
 0x130   :  { %v169_v50 = vmul.f32 %v406_v49, %v146_v39 }
 0x132   :  { %v171_v51 = vmul.f32 %v169_v50, %v148_v41 }
 0x133   :  { %v408_v52 = vpop.eup %407 }
 0x134   :  { %v170_v53 = vmul.f32 %v408_v52, %v152_v42  ;;  %349 = vmatprep.mubr.f32.mxu1 %v171_v51 }
 0x136   :  { %v172_v54 = vmul.f32 %v170_v53, %v154_v44 }
 0x138   :  { %350 = vmatmul.mubr.f32.vlgmr.msra.gmra.mrb[0].mxu1 %v172_v54 }
 0x20b   :  { %v351_v57 = vpop.f32.mrb[0].mxu1 }
 0x20c   :  { %v267_v58 = vadd.f32 %v351_v57, %v174_v55  ;;  %v257_v59 = vpop.f32.mrb[1].mxu1 }
 0x20d   :  { %v266_v60 = vadd.f32 %v257_v59, %v173_v56 }
 0x20e   :  { %269 = vst.msk [vmem:[#allocation2 + $0x8] sm:$0xff] %vm60_vm0, %v267_v58 }
 0x20f   :  { %268 = vst.msk [vmem:[#allocation2] sm:$0xff] %vm60_vm0, %v266_v60 }
 0x215   :  { %v274_v61 = vld [vmem:[#allocation2 + $0x8] sm:$0xff] }
 0x216   :  { %v273_v62 = vld [vmem:[#allocation2] sm:$0xff]  ;;  %276 = vst.msk [vmem:[#allocation9 + $0x8] sm:$0xff] %vm60_vm0, %v274_v61 }
 0x217   :  { %275 = vst.msk [vmem:[#allocation9] sm:$0xff] %vm60_vm0, %v273_v62 }
 0x218   :  { %486 = shalt.err (!%p483_p0)
}
 0x219   :  { %s487_s27 = scalar_lea.hbm %s600_s3, 256 }
 0x21a   :  { %p488_p1 = scmp.ne.s32.totalorder %s600_s3, %s487_s27  ;;  %p491_p2 = scmp.lt.u32.totalorder %s487_s27, %s600_s3 }
 0x21c   :  { %p493_p3 = pnand %p491_p2, %p488_p1 }
 0x21e   :  { %496 = shalt.err (!%p493_p3)
}
 0x21f   :  { %288 = dma.vmem_to_hbm [thread:$0]  %s283_s23, 256, %s600_s3, [#allocation5], %s507_s1, %s507_s1, %s508_s9  }
 0x220   :  { %501 = dma.done.wait [#allocation5], 256  }
 0x221   :  { %502 = vsyncadd [#allocation5], 4294967040 }
 0x222   :  { %292 = vsyncpa [#allocation4], 1 }
 0x223   :  { %293 = vsyncpa [#allocation7], 1 }
 0x224   :  { %294 = vsyncpa [#allocation5], 1 }

</bundles_post_ra>
